<compile_context>
chip_gen: v7x
topology: tpu7x:2x2x1
jax: 0.10.0
libtpu: 0.0.40
codegen_flags: <defaults>
</compile_context>

<pallas_src>
import functools

import jax
import jax.numpy as jnp
from jax.experimental import pallas as pl
from jax.experimental.pallas import tpu as pltpu

LANES = 128
SUBLANES = 8


def _int_power(base, n):
    """base**n for static integer n >= 1 via exponentiation by squaring (VPU-only)."""
    result = None
    e = n
    while e > 0:
        if e & 1:
            result = base if result is None else result * base
        e >>= 1
        if e:
            base = base * base
    return result


def _focal_loss_kernel(x_ref, t_ref, o_ref, acc_ref, *,
                       alpha, gamma, n_valid, do_mean, has_tail, tail_valid):
    i = pl.program_id(0)
    nb = pl.num_programs(0)

    @pl.when(i == 0)
    def _():
        acc_ref[...] = jnp.zeros_like(acc_ref)

    x = x_ref[...].astype(jnp.float32)
    t = t_ref[...].astype(jnp.float32)

    # numerically-stable BCE with logits (elementwise, no reduction):
    #   bce = max(x, 0) - x*t + log(1 + exp(-|x|))
    bce = jnp.maximum(x, 0.0) - x * t + jnp.log1p(jnp.exp(-jnp.abs(x)))
    pt = jnp.exp(-bce)
    one_minus_pt = 1.0 - pt

    g = float(gamma)
    if g == 0.0:
        f_loss = bce
    elif g.is_integer() and g > 0:
        # integer power: pure VPU multiplies, no extra EUP transcendentals
        f_loss = _int_power(one_minus_pt, int(g)) * bce
    else:
        # pt can round slightly above 1.0; clamp to avoid pow(neg, float) = NaN
        f_loss = (jnp.maximum(one_minus_pt, 0.0) ** g) * bce
    if float(alpha) != 1.0:
        f_loss = float(alpha) * f_loss

    def fold_to_vreg(v):
        # (block_rows, 128) -> (8, 128) via layout-preserving reshape + vreg adds (VPU only)
        return v.reshape(-1, SUBLANES, LANES).sum(axis=0)

    if not has_tail:
        # every block is fully valid: plain VPU accumulate
        acc_ref[...] += fold_to_vreg(f_loss)
    else:
        is_last = i == nb - 1

        @pl.when(jnp.logical_not(is_last))
        def _():
            acc_ref[...] += fold_to_vreg(f_loss)

        @pl.when(is_last)
        def _():
            # Only the final block contains padded / out-of-bounds elements.
            # Mask with block-local indices (no int32 overflow; block elems < 2^31).
            row_ids = jax.lax.broadcasted_iota(jnp.int32, f_loss.shape, 0)
            col_ids = jax.lax.broadcasted_iota(jnp.int32, f_loss.shape, 1)
            local_idx = row_ids * LANES + col_ids
            masked = jnp.where(local_idx < tail_valid, f_loss, 0.0)
            acc_ref[...] += fold_to_vreg(masked)

    @pl.when(i == nb - 1)
    def _():
        total = jnp.sum(acc_ref[...], keepdims=True)  # single XLU reduce, (1, 1)
        if do_mean:
            total = total / jnp.float32(n_valid)
        o_ref[...] = total


def focal_loss(inputs, targets, *, alpha=1.0, gamma=2.0, reduce='mean',
               block_rows=4096):
    if reduce not in ('mean', 'sum'):
        raise NotImplementedError(reduce)

    n_valid = int(inputs.size)

    # rows of 128 lanes, padded up to a multiple of 8 sublanes
    rows = pl.cdiv(n_valid, LANES)
    rows8 = pl.cdiv(rows, SUBLANES) * SUBLANES
    n_padded = rows8 * LANES

    # clamp block size for small inputs; keep it a multiple of 8 sublanes.
    # default 4096 rows * 128 lanes * 4B = 2 MiB f32 / input block
    # -> 8 MiB double-buffered inputs + 4 KiB accumulator.
    block_rows = int(min(int(block_rows), rows8))
    block_rows = max(SUBLANES, (block_rows // SUBLANES) * SUBLANES)

    num_blocks = pl.cdiv(rows8, block_rows)
    block_elems = block_rows * LANES
    tail_valid = n_valid - (num_blocks - 1) * block_elems
    has_tail = tail_valid != block_elems  # last block not fully valid data

    # keep original dtype (kernel casts per block); only pad (one HBM copy) when
    # the flat size is not already a multiple of 8*128 (rare for NCHW tensors).
    x_flat = inputs.reshape(-1)
    t_flat = targets.reshape(-1)
    if n_padded != n_valid:
        pad = n_padded - n_valid
        x_flat = jnp.pad(x_flat, (0, pad))
        t_flat = jnp.pad(t_flat, (0, pad))
    x2 = x_flat.reshape(rows8, LANES)
    t2 = t_flat.reshape(rows8, LANES)

    kernel = functools.partial(
        _focal_loss_kernel,
        alpha=float(alpha),
        gamma=float(gamma),
        n_valid=n_valid,
        do_mean=(reduce == 'mean'),
        has_tail=bool(has_tail),
        tail_valid=int(tail_valid),
    )

    out = pl.pallas_call(
        kernel,
        out_shape=jax.ShapeDtypeStruct((1, 1), jnp.float32),
        grid_spec=pltpu.PrefetchScalarGridSpec(
            num_scalar_prefetch=0,
            grid=(num_blocks,),
            in_specs=[
                pl.BlockSpec((block_rows, LANES), lambda i: (i, 0)),
                pl.BlockSpec((block_rows, LANES), lambda i: (i, 0)),
            ],
            out_specs=pl.BlockSpec((1, 1), lambda i: (0, 0)),
            scratch_shapes=[pltpu.VMEM((SUBLANES, LANES), jnp.float32)],
        ),
        compiler_params=pltpu.CompilerParams(
            dimension_semantics=("arbitrary",),
            vmem_limit_bytes=32 * 1024 * 1024,
        ),
    )(x2, t2)

    # TODO(synk): on v7x a leading size-2 "parallel" grid axis with per-core
    # partial sums (combined in the wrapper) would use both TensorCores; kept
    # single-core for simplicity since the kernel is HBM-bound.
    return out[0, 0]


def _focal_loss_ref(inputs, targets, alpha=1.0, gamma=2.0, reduce='mean'):
    x = inputs.astype(jnp.float32)
    t = targets.astype(jnp.float32)
    bce = jnp.maximum(x, 0.0) - x * t + jnp.log1p(jnp.exp(-jnp.abs(x)))
    pt = jnp.exp(-bce)
    f_loss = alpha * (1.0 - pt) ** gamma * bce
    return jnp.mean(f_loss) if reduce == 'mean' else jnp.sum(f_loss)


if __name__ == "__main__":
    key = jax.random.PRNGKey(0)
    k1, k2 = jax.random.split(key)

    # NCHW inputs (logits) and binary targets, matching the PyTorch module
    x = jax.random.normal(k1, (2, 4, 16, 16), dtype=jnp.float32)
    tgt = (jax.random.uniform(k2, (2, 4, 16, 16)) > 0.5).astype(jnp.float32)

    out = focal_loss(x, tgt, alpha=1.0, gamma=2.0, reduce='mean')
    out = jax.block_until_ready(out)
    ref = _focal_loss_ref(x, tgt, alpha=1.0, gamma=2.0, reduce='mean')
    assert jnp.allclose(out, ref, rtol=1e-5, atol=1e-6), (out, ref)

    # also exercise the 'sum' reduction and a non-multiple-of-128 size (tail mask path)
    x3 = jax.random.normal(k1, (3, 5, 7, 11), dtype=jnp.float32)
    t3 = (jax.random.uniform(k2, (3, 5, 7, 11)) > 0.5).astype(jnp.float32)
    out2 = jax.block_until_ready(focal_loss(x3, t3, reduce='sum'))
    ref2 = _focal_loss_ref(x3, t3, reduce='sum')
    assert jnp.allclose(out2, ref2, rtol=1e-5, atol=1e-5), (out2, ref2)

    print("KERNEL_OK")
</pallas_src>

<mosaic_0001>
module attributes {stable_mosaic.version = 11 : i64} {
  func.func @_focal_loss_kernel(%arg0: i32, %arg1: memref<16x128xf32, #tpu.memory_space<vmem>>, %arg2: memref<16x128xf32, #tpu.memory_space<vmem>>, %arg3: memref<1x1xf32, #tpu.memory_space<vmem>>, %arg4: memref<8x128xf32, #tpu.memory_space<vmem>>) attributes {dimension_semantics = [#tpu.dimension_semantics<arbitrary>], iteration_bounds = array<i64: 1>, scalar_prefetch = 0 : i64, scratch_operands = 1 : i64, tpu.core_type = #tpu.core_type<tc>, window_params = [{transform_indices = @transform_0, window_bounds = array<i64: 16, 128>}, {transform_indices = @transform_1, window_bounds = array<i64: 16, 128>}, {pipeline_mode = #tpu.pipeline_mode<synchronous>, transform_indices = @transform_2, window_bounds = array<i64: 1, 1>}]} {
    %c0_i32 = arith.constant 0 : i32
    %0 = arith.cmpi eq, %arg0, %c0_i32 : i32
    %1 = arith.extui %0 : i1 to i32
    %c0_i32_0 = arith.constant 0 : i32
    %2 = arith.cmpi ne, %1, %c0_i32_0 : i32
    scf.if %2 {
      %cst_14 = arith.constant 0.000000e+00 : f32
      %30 = vector.broadcast %cst_14 : f32 to vector<8x128xf32>
      %c0_15 = arith.constant 0 : index
      %c0_16 = arith.constant 0 : index
      %31 = vector.load %arg4[%c0_15, %c0_16] : memref<8x128xf32, #tpu.memory_space<vmem>>, vector<8x128xf32>
      tpu.vector_store %arg4[%c0_15, %c0_16], %30 {strides = array<i32>} : memref<8x128xf32, #tpu.memory_space<vmem>>, vector<8x128xf32>,
    } else {
    }
    %c0 = arith.constant 0 : index
    %c0_1 = arith.constant 0 : index
    %3 = vector.load %arg1[%c0, %c0_1] : memref<16x128xf32, #tpu.memory_space<vmem>>, vector<16x128xf32>
    %c0_2 = arith.constant 0 : index
    %c0_3 = arith.constant 0 : index
    %4 = vector.load %arg2[%c0_2, %c0_3] : memref<16x128xf32, #tpu.memory_space<vmem>>, vector<16x128xf32>
    %cst = arith.constant 0.000000e+00 : f32
    %5 = vector.broadcast %cst : f32 to vector<16x128xf32>
    %6 = arith.maximumf %3, %5 : vector<16x128xf32>
    %7 = arith.mulf %3, %4 : vector<16x128xf32>
    %8 = arith.subf %6, %7 : vector<16x128xf32>
    %9 = math.absf %3 : vector<16x128xf32>
    %cst_4 = arith.constant 0.000000e+00 : f32
    %10 = vector.broadcast %cst_4 : f32 to vector<16x128xf32>
    %11 = arith.subf %10, %9 : vector<16x128xf32>
    %12 = math.exp %11 : vector<16x128xf32>
    %13 = math.log1p %12 : vector<16x128xf32>
    %14 = arith.addf %8, %13 : vector<16x128xf32>
    %cst_5 = arith.constant 0.000000e+00 : f32
    %15 = vector.broadcast %cst_5 : f32 to vector<16x128xf32>
    %16 = arith.subf %15, %14 : vector<16x128xf32>
    %17 = math.exp %16 : vector<16x128xf32>
    %cst_6 = arith.constant 1.000000e+00 : f32
    %18 = vector.broadcast %cst_6 : f32 to vector<16x128xf32>
    %19 = arith.subf %18, %17 : vector<16x128xf32>
    %20 = arith.mulf %19, %19 : vector<16x128xf32>
    %21 = arith.mulf %20, %14 : vector<16x128xf32>
    %c0_7 = arith.constant 0 : index
    %c0_8 = arith.constant 0 : index
    %22 = vector.load %arg4[%c0_7, %c0_8] : memref<8x128xf32, #tpu.memory_space<vmem>>, vector<8x128xf32>
    %23 = vector.shape_cast %21 : vector<16x128xf32> to vector<2x8x128xf32>
    %cst_9 = arith.constant dense<0.000000e+00> : vector<8x128xf32>
    %24 = vector.multi_reduction <add>, %23, %cst_9 [0] : vector<2x8x128xf32> to vector<8x128xf32>
    %25 = arith.addf %22, %24 : vector<8x128xf32>
    %c0_10 = arith.constant 0 : index
    %c0_11 = arith.constant 0 : index
    %26 = vector.load %arg4[%c0_10, %c0_11] : memref<8x128xf32, #tpu.memory_space<vmem>>, vector<8x128xf32>
    tpu.vector_store %arg4[%c0_10, %c0_11], %25 {strides = array<i32>} : memref<8x128xf32, #tpu.memory_space<vmem>>, vector<8x128xf32>,
    %c0_i32_12 = arith.constant 0 : i32
    %27 = arith.cmpi eq, %arg0, %c0_i32_12 : i32
    %28 = arith.extui %27 : i1 to i32
    %c0_i32_13 = arith.constant 0 : i32
    %29 = arith.cmpi ne, %28, %c0_i32_13 : i32
    scf.if %29 {
      %c0_14 = arith.constant 0 : index
      %c0_15 = arith.constant 0 : index
      %30 = vector.load %arg4[%c0_14, %c0_15] : memref<8x128xf32, #tpu.memory_space<vmem>>, vector<8x128xf32>
      %31 = vector.shape_cast %30 : vector<8x128xf32> to vector<1x8x128xf32>
      %cst_16 = arith.constant dense<0.000000e+00> : vector<1xf32>
      %32 = vector.multi_reduction <add>, %31, %cst_16 [1, 2] : vector<1x8x128xf32> to vector<1xf32>
      %33 = vector.shape_cast %32 : vector<1xf32> to vector<1x1x1xf32>
      %34 = vector.extract %33[0, 0, 0] : f32 from vector<1x1x1xf32>
      %35 = vector.broadcast %34 : f32 to vector<1x1xf32>
      %cst_17 = arith.constant 2.048000e+03 : f32
      %36 = vector.broadcast %cst_17 : f32 to vector<1x1xf32>
      %37 = arith.divf %35, %36 : vector<1x1xf32>
      %c0_18 = arith.constant 0 : index
      %c0_19 = arith.constant 0 : index
      %38 = vector.load %arg3[%c0_18, %c0_19] : memref<1x1xf32, #tpu.memory_space<vmem>>, vector<1x1xf32>
      tpu.vector_store %arg3[%c0_18, %c0_19], %37 {strides = array<i32>} : memref<1x1xf32, #tpu.memory_space<vmem>>, vector<1x1xf32>,
    } else {
    }
    return
  }
  func.func @transform_0(%arg0: i32) -> (i32, i32) {
    %c0_i32 = arith.constant 0 : i32
    %c0_i32_0 = arith.constant 0 : i32
    return %arg0, %c0_i32 : i32, i32
  }
  func.func @transform_1(%arg0: i32) -> (i32, i32) {
    %c0_i32 = arith.constant 0 : i32
    %c0_i32_0 = arith.constant 0 : i32
    return %arg0, %c0_i32 : i32, i32
  }
  func.func @transform_2(%arg0: i32) -> (i32, i32) {
    %c0_i32 = arith.constant 0 : i32
    %c0_i32_0 = arith.constant 0 : i32
    %c0_i32_1 = arith.constant 0 : i32
    return %c0_i32, %c0_i32_0 : i32, i32
  }
}

</mosaic_0001>

<bundles_post_ra>
// kernel: tpu_custom_call.1
= control target key start
LH: loop header
LB: loop body
LE: loop exit
PB: predicated region body
PF: predicated region fallthrough
CT: control target
= control target key end

     0   :  { %7 = vsyncpa [#allocation4], 0  ;;  %s280_s0 = inlined_call_operand.hbm [shape: f32[16,128], index: 0, kind: input, shape index: {}]   ;;  %s281_s1 = inlined_call_operand.hbm [shape: f32[16,128], index: 1, kind: input, shape index: {}]   ;;  %s282_s2 = inlined_call_operand.hbm [shape: f32[1,1], index: 2, kind: output, shape index: {}]  }
   0x1   :  { %8 = vsyncpa [#allocation7], 0 }
   0x2   :  { %9 = vsyncpa [#allocation5], 0  ;;  %s224_s9 = smov [#allocation3]   ;;  %s152_s13 = scalar_lea.hbm %s280_s0, 256 }
   0x3   :  { %s15_s10 = sshll.u32 %s224_s9, 4  ;;  %p153_p0 = scmp.ne.s32.totalorder %s280_s0, %s152_s13  ;;  %s16_s10 = int_to_ptr.vmem [resolvable:$true] %s15_s10 }
   0x4   :  { %p156_p1 = scmp.lt.u32.totalorder %s152_s13, %s280_s0 }
   0x6   :  { %p158_p2 = pnand %p156_p1, %p153_p0 }
   0x8   :  { %161 = shalt.err (!%p158_p2)
}
   0x9   :  { %s162_s18 = scalar_lea.vmem %s16_s10, 256  ;;  %p167_p4 = scmp.lt.s32.totalorder %s16_s10, %s16_s10 }
   0xa   :  { %p163_p3 = scmp.ne.s32.totalorder %s16_s10, %s162_s18  ;;  %p168_p5 = scmp.lt.s32.totalorder %s162_s18, %s162_s18 }
   0xc   :  { %p169_p6 = por %p168_p5, %p167_p4 }
   0xe   :  { %p170_p7 = pnand %p169_p6, %p163_p3 }
  0x10   :  { %173 = shalt.err (!%p170_p7)
}
  0x11   :  { %s225_s19 = smov 128   ;;  %s226_s20 = smov 8  }
  0x12   :  { %21 = dma.hbm_to_vmem [thread:$0]  %s280_s0, 256, %s16_s10, [#allocation4], %s225_s19, %s225_s19, %s226_s20  }
  0x13   :  { %s227_s23 = smov [#allocation6]   ;;  %s174_s27 = scalar_lea.hbm %s281_s1, 256 }
  0x14   :  { %s27_s24 = sshll.u32 %s227_s23, 4  ;;  %p175_p8 = scmp.ne.s32.totalorder %s281_s1, %s174_s27  ;;  %s28_s24 = int_to_ptr.vmem [resolvable:$true] %s27_s24 }
  0x15   :  { %p178_p9 = scmp.lt.u32.totalorder %s174_s27, %s281_s1 }
  0x17   :  { %p180_p10 = pnand %p178_p9, %p175_p8 }
  0x19   :  { %183 = shalt.err (!%p180_p10)
}
  0x1a   :  { %s184_s4 = scalar_lea.vmem %s28_s24, 256  ;;  %p189_p12 = scmp.lt.s32.totalorder %s28_s24, %s28_s24 }
  0x1b   :  { %p185_p11 = scmp.ne.s32.totalorder %s28_s24, %s184_s4  ;;  %p190_p13 = scmp.lt.s32.totalorder %s184_s4, %s184_s4 }
  0x1d   :  { %p191_p0 = por %p190_p13, %p189_p12 }
  0x1f   :  { %p192_p1 = pnand %p191_p0, %p185_p11 }
  0x21   :  { %195 = shalt.err (!%p192_p1)
}
  0x22   :  { %33 = dma.hbm_to_vmem [thread:$0]  %s281_s1, 256, %s28_s24, [#allocation7], %s225_s19, %s225_s19, %s226_s20  }
  0x23   :  { %218 = dma.done.wait [#allocation4], 256  }
  0x24   :  { %219 = vsyncadd [#allocation4], 4294967040 }
  0x25   :  { %220 = dma.done.wait [#allocation7], 256  }
  0x26   :  { %221 = vsyncadd [#allocation7], 4294967040  ;;  %v45_v0 = vld [vmem:[#allocation3] sm:$0xff]  ;;  %v46_v1 = vld [vmem:[#allocation3 + $0x8] sm:$0xff]  ;;  %s228_s1 = smov [#allocation8]   ;;  %vm115_vm2 = vcmask 0  }
  0x27   :  { %v55_v2 = vand.u32 2147483647, %v45_v0  ;;  %v56_v3 = vand.u32 2147483647, %v46_v1  ;;  %v47_v14 = vld [vmem:[#allocation6] sm:$0xff]  ;;  %v48_v15 = vld [vmem:[#allocation6 + $0x8] sm:$0xff] }
  0x28   :  { %v49_v17 = vmax.f32 %v45_v0, 0.0  ;;  %v51_v18 = vmul.f32 %v47_v14, %v45_v0  ;;  %v50_v21 = vmax.f32 %v46_v1, 0.0  ;;  %v52_v22 = vmul.f32 %v48_v15, %v46_v1  ;;  %s123_s6 = sshll.u32 %s228_s1, 4  ;;  %s124_s6 = int_to_ptr.vmem [resolvable:$true] %s123_s6 }
  0x29   :  { %v57_v4 = vsub.f32 0.0, %v55_v2  ;;  %v58_v5 = vsub.f32 0.0, %v56_v3  ;;  %s196_s8 = scalar_lea.vmem %s124_s6, 16  ;;  %s200_s9 = scalar_lea.vmem %s124_s6, 32 }
  0x2a   :  { %v53_v26 = vsub.f32 %v49_v17, %v51_v18  ;;  %v54_v29 = vsub.f32 %v50_v21, %v52_v22  ;;  %p197_p2 = scmp.ne.s32.totalorder %s124_s6, %s196_s8  ;;  %p201_p3 = scmp.lt.s32.totalorder %s124_s6, %s124_s6 }
  0x2b   :  { %v59_v6 = vmul.f32 1.442695, %v57_v4  ;;  %v61_v7 = vmul.f32 1.442695, %v58_v5  ;;  %p202_p4 = scmp.lt.s32.totalorder %s200_s9, %s196_s8 }
  0x2d   :  { %140 = vpow2.f32 %v59_v6  ;;  %p203_p5 = por %p202_p4, %p201_p3 }
  0x2e   :  { %142 = vpow2.f32 %v61_v7 }
  0x2f   :  { %p204_p6 = pnand %p203_p5, %p197_p2 }
  0x37   :  { %v141_v8 = vpop.eup %140 }
  0x38   :  { %v143_v9 = vpop.eup %142  ;;  %v63_v10 = vadd.f32 1.0, %v141_v8  ;;  %v66_v12 = vmul.f32 -0.5, %v141_v8  ;;  %v69_v19 = vand.u32 2147483647, %v141_v8 }
  0x39   :  { %v72_v11 = vadd.f32 1.0, %v143_v9  ;;  %v75_v13 = vmul.f32 -0.5, %v143_v9  ;;  %v78_v23 = vand.u32 2147483647, %v143_v9 }
  0x3a   :  { %144 = vlog2.f32 %v63_v10  ;;  %v67_v16 = vadd.f32 1.0, %v66_v12  ;;  %vm70_vm0 = vcmp.lt.f32.partialorder %v69_v19, 0.0004427343 }
  0x3b   :  { %146 = vlog2.f32 %v72_v11  ;;  %v76_v20 = vadd.f32 1.0, %v75_v13  ;;  %vm79_vm1 = vcmp.lt.f32.partialorder %v78_v23, 0.0004427343 }
  0x3c   :  { %v68_v24 = vmul.f32 %v141_v8, %v67_v16 }
  0x3d   :  { %v77_v27 = vmul.f32 %v143_v9, %v76_v20 }
  0x44   :  { %v145_v25 = vpop.eup %144 }
  0x45   :  { %v147_v28 = vpop.eup %146  ;;  %v65_v30 = vmul.f32 0.6931472, %v145_v25 }
  0x46   :  { %v74_v31 = vmul.f32 0.6931472, %v147_v28 }
  0x47   :  { %v71_v32 = vsel %vm70_vm0, %v68_v24, %v65_v30 }
  0x48   :  { %v80_v33 = vsel %vm79_vm1, %v77_v27, %v74_v31  ;;  %v81_v34 = vadd.f32 %v71_v32, %v53_v26 }
  0x49   :  { %v82_v35 = vadd.f32 %v80_v33, %v54_v29 }
  0x4a   :  { %v83_v36 = vsub.f32 0.0, %v81_v34 }
  0x4b   :  { %v84_v37 = vsub.f32 0.0, %v82_v35 }
  0x4c   :  { %v85_v38 = vmul.f32 1.442695, %v83_v36 }
  0x4d   :  { %v87_v39 = vmul.f32 1.442695, %v84_v37 }
  0x4e   :  { %148 = vpow2.f32 %v85_v38 }
  0x4f   :  { %150 = vpow2.f32 %v87_v39 }
  0x58   :  { %v149_v40 = vpop.eup %148 }
  0x59   :  { %v151_v41 = vpop.eup %150  ;;  %v89_v42 = vsub.f32 1.0, %v149_v40 }
  0x5a   :  { %v90_v43 = vsub.f32 1.0, %v151_v41 }
  0x5b   :  { %v91_v44 = vmul.f32 %v89_v42, %v89_v42 }
  0x5c   :  { %v92_v45 = vmul.f32 %v90_v43, %v90_v43 }
  0x5d   :  { %v93_v46 = vmul.f32 %v91_v44, %v81_v34 }
  0x5e   :  { %v94_v47 = vmul.f32 %v92_v45, %v82_v35 }
  0x60   :  { %v96_v48 = vadd.f32 %v94_v47, %v93_v46 }
  0x62   :  { %103 = vadd.xlane.f32.xlu0 %v96_v48 }
  0xef   :  { %v104_v49 = vpop.xlane.xlu0 %103 }
  0xf0   :  { %v105_v50 = vrot.slane %v104_v49, 4 }
  0xf2   :  { %v106_v51 = vadd.f32 %v105_v50, %v104_v49 }
  0xf4   :  { %v107_v52 = vrot.slane %v106_v51, 2 }
  0xf6   :  { %v108_v53 = vadd.f32 %v107_v52, %v106_v51 }
  0xf8   :  { %v109_v54 = vrot.slane %v108_v53, 1 }
  0xfa   :  { %v110_v55 = vadd.f32 %v109_v54, %v108_v53 }
  0xfc   :  { %133 = vpush %v110_v55 }
 0x12d   :  { %s134_s7 = spop %133 }
 0x12e   :  { %v112_v56 = vstv %s134_s7 }
 0x12f   :  { %v114_v57 = vmul.f32 0.00048828125, %v112_v56 }
 0x131   :  { %116 = vst.msk [vmem:[#allocation8] sm:$0x1] %vm115_vm2, %v114_v57 }
 0x132   :  { %207 = shalt.err (!%p204_p6)
}
 0x133   :  { %s208_s12 = scalar_lea.hbm %s282_s2, 16 }
 0x134   :  { %p209_p7 = scmp.ne.s32.totalorder %s282_s2, %s208_s12  ;;  %p212_p8 = scmp.lt.u32.totalorder %s208_s12, %s282_s2 }
 0x136   :  { %p214_p9 = pnand %p212_p8, %p209_p7 }
 0x138   :  { %217 = shalt.err (!%p214_p9)
}
 0x139   :  { %126 = dma.vmem_to_hbm [thread:$0]  %s124_s6, 16, %s282_s2, [#allocation5]  }
 0x13a   :  { %222 = dma.done.wait [#allocation5], 16  }
 0x13b   :  { %223 = vsyncadd [#allocation5], 4294967280 }
 0x13c   :  { %130 = vsyncpa [#allocation4], 1 }
 0x13d   :  { %131 = vsyncpa [#allocation7], 1 }
 0x13e   :  { %132 = vsyncpa [#allocation5], 1 }

</bundles_post_ra>
